<compile_context>
chip_gen: v7x
topology: tpu7x:2x2x1
jax: 0.10.0
libtpu: 0.0.40
codegen_flags: <defaults>
</compile_context>

<pallas_src>
import functools
import math

import jax
import jax.numpy as jnp
from jax.experimental import pallas as pl
from jax.experimental.pallas import tpu as pltpu


# ----------------------------------------------------------------------------
# In-kernel helpers (traced inside the single fused kernel)
# ----------------------------------------------------------------------------

def _masked_row_softmax(scores, mask_bool, negative_slope):
    """LeakyReLU -> masked row softmax (PyG segment softmax over target node)."""
    s = jnp.where(scores >= 0.0, scores, negative_slope * scores)   # LeakyReLU
    s = jnp.where(mask_bool, s, jnp.float32(-1e30))
    row_max = jnp.max(s, axis=-1, keepdims=True)
    p = jnp.exp(s - row_max)
    p = jnp.where(mask_bool, p, 0.0)              # isolated rows -> all zeros
    denom = jnp.maximum(jnp.sum(p, axis=-1, keepdims=True), jnp.float32(1e-30))
    # reciprocal on the EUP slot instead of an N*N VALU divide
    return p * pl.reciprocal(denom, approx=True)


def _gat_conv(x, w, att_proj, bias, mask_bool, *, heads, out_ch,
              negative_slope, mxu_dtype):
    """One NormGATConv(concat=True) with fused bias + ReLU. Whole graph in VMEM.

    x        : (N, Fin)
    w        : (Fin, H*C)      lin.weight (stored transposed)
    att_proj : (H*C, 2H)       block-diagonal packing of att_i / att_j
    bias     : (1, H*C)
    """
    # x' = lin(x): one MXU matmul (f32 accumulation).
    xw = jnp.dot(x.astype(mxu_dtype), w.astype(mxu_dtype),
                 preferred_element_type=jnp.float32)                 # (N, H*C)
    # All per-head alpha_i / alpha_j projections in a single MXU matmul
    # (replaces per-head 8-wide XLU reductions):
    alpha = jnp.dot(xw.astype(mxu_dtype), att_proj.astype(mxu_dtype),
                    preferred_element_type=jnp.float32)              # (N, 2H)

    head_cols = []
    for h in range(heads):                      # heads is tiny and static
        ai = alpha[:, h]                        # (N,)  <x'_i, att_i[h]>
        aj = alpha[:, heads + h]                # (N,)  <x'_j, att_j[h]>
        # edge (j -> i): score[i, j] = ai[i] + aj[j]
        attn = _masked_row_softmax(ai[:, None] + aj[None, :],
                                   mask_bool, negative_slope)        # (N, N)
        xh = xw[:, h * out_ch:(h + 1) * out_ch]                      # (N, C)
        head_cols.append(jnp.dot(attn.astype(mxu_dtype), xh.astype(mxu_dtype),
                                 preferred_element_type=jnp.float32))
    out = jnp.concatenate(head_cols, axis=-1) + bias                 # (N, H*C)
    return jnp.maximum(out, 0.0)                # fused F.relu epilogue


# ----------------------------------------------------------------------------
# The single fused kernel
# ----------------------------------------------------------------------------

def _gatnet_kernel(x0_ref, mask_ref,
                   w1_ref, a1_ref, b1_ref,
                   w2_ref, a2_ref, b2_ref,
                   w3_ref, a3_ref, b3_ref,
                   lw_ref, lb_ref,
                   out_ref, emb_ref,
                   *, num_heads, hidden, negative_slope, mxu_dtype):
    # int8 adjacency -> bool once; reused by every head of every layer.
    mask_bool = mask_ref[...].astype(jnp.int32) != 0

    conv = functools.partial(_gat_conv, mask_bool=mask_bool,
                             negative_slope=negative_slope,
                             mxu_dtype=mxu_dtype)

    # x1 / x2 / x3 never leave VMEM (no HBM round trips between layers).
    x1 = conv(x0_ref[...], w1_ref[...], a1_ref[...], b1_ref[...],
              heads=num_heads, out_ch=hidden)
    x2 = conv(x1, w2_ref[...], a2_ref[...], b2_ref[...],
              heads=2, out_ch=hidden)          # GATNet hardcodes heads=2 here
    x3 = conv(x2, w3_ref[...], a3_ref[...], b3_ref[...],
              heads=2, out_ch=hidden)

    xcat = jnp.concatenate([x1, x2, x3], axis=-1)        # (N, 3*H*C), in VMEM
    out_ref[...] = (jnp.dot(xcat.astype(mxu_dtype), lw_ref[...].astype(mxu_dtype),
                            preferred_element_type=jnp.float32)
                    + lb_ref[...])
    emb_ref[...] = x1 + x2 + x3


# ----------------------------------------------------------------------------
# Host-side wrappers
# ----------------------------------------------------------------------------

def _pack_att_proj(att_i, att_j):
    """(H, C) att_i/att_j -> (H*C, 2H) block-diagonal matrix so that
    lin(x) @ att_proj == [alpha_i heads | alpha_j heads] in one matmul."""
    heads, out_ch = att_i.shape
    proj = jnp.zeros((heads * out_ch, 2 * heads), jnp.float32)
    for h in range(heads):
        proj = proj.at[h * out_ch:(h + 1) * out_ch, h].set(att_i[h])
        proj = proj.at[h * out_ch:(h + 1) * out_ch, heads + h].set(att_j[h])
    return proj


def _nbytes(a):
    return a.size * jnp.dtype(a.dtype).itemsize


def gatnet_forward(params, x0, mask, *, hidden_channels, num_heads=2,
                   negative_slope=0.2, mxu_dtype=jnp.float32):
    """Eval-mode GATNet forward: returns (lin(cat(x1,x2,x3)), x1+x2+x3)."""
    n = x0.shape[0]
    out_channels = params["lin_w"].shape[1]
    hc = num_heads * hidden_channels

    def prep(conv):
        return (conv["w"],
                _pack_att_proj(conv["att_i"], conv["att_j"]),
                conv["bias"].reshape(1, -1))

    w1, a1, b1 = prep(params["conv1"])
    w2, a2, b2 = prep(params["conv2"])
    w3, a3, b3 = prep(params["conv3"])
    lw = params["lin_w"]
    lb = params["lin_b"].reshape(1, -1)

    kernel = functools.partial(_gatnet_kernel, num_heads=num_heads,
                               hidden=hidden_channels,
                               negative_slope=negative_slope,
                               mxu_dtype=mxu_dtype)

    inputs = (x0, mask, w1, a1, b1, w2, a2, b2, w3, a3, b3, lw, lb)

    # Working-set estimate (params + mask + per-head (N,N) temporaries +
    # features), x4 margin; clamped to a range valid on v5e/v6e/v7x (v7x has
    # only 64 MiB VMEM per TensorCore, default scoped limit 32 MiB).
    work = (sum(_nbytes(t) for t in inputs)
            + 3 * n * n * 4                      # scores / probs temporaries
            + 6 * n * (3 * hc + out_channels) * 4)
    vmem_limit = int(min(max(4 * work, 16 * 1024 * 1024), 32 * 1024 * 1024))

    vmem_spec = pl.BlockSpec(memory_space=pltpu.MemorySpace.VMEM)

    out, emb = pl.pallas_call(
        kernel,
        out_shape=(jax.ShapeDtypeStruct((n, out_channels), jnp.float32),
                   jax.ShapeDtypeStruct((n, hc), jnp.float32)),
        in_specs=[vmem_spec] * len(inputs),
        out_specs=(vmem_spec, vmem_spec),
        compiler_params=pltpu.CompilerParams(vmem_limit_bytes=vmem_limit),
    )(*inputs)
    return out, emb


def edge_index_to_mask(edge_index, num_nodes):
    """Dense int8 adjacency: mask[dst, src] = 1 (include self-loops yourself)."""
    src, dst = edge_index[0], edge_index[1]
    mask = jnp.zeros((num_nodes, num_nodes), jnp.int8)
    return mask.at[dst, src].set(1)


# ----------------------------------------------------------------------------
# Parameter init (mirrors the PyTorch module's shapes + glorot/zeros)
# ----------------------------------------------------------------------------

def _glorot(key, shape, fan_sum):
    stdv = math.sqrt(6.0 / fan_sum)
    return jax.random.uniform(key, shape, jnp.float32, -stdv, stdv)


def init_norm_gat_conv(key, in_ch, out_ch, heads):
    k1, k2, k3 = jax.random.split(key, 3)
    # torch lin.weight is (heads*out_ch, in_ch); glorot over those two dims.
    w = _glorot(k1, (in_ch, heads * out_ch), heads * out_ch + in_ch)
    att_i = _glorot(k2, (heads, out_ch), heads + out_ch)
    att_j = _glorot(k3, (heads, out_ch), heads + out_ch)
    bias = jnp.zeros((heads * out_ch,), jnp.float32)
    return {"w": w, "att_i": att_i, "att_j": att_j, "bias": bias}


def init_gatnet(key, in_channels, hidden_channels, out_channels, num_heads=2):
    k1, k2, k3, k4, _ = jax.random.split(key, 5)
    return {
        "conv1": init_norm_gat_conv(k1, in_channels, hidden_channels, num_heads),
        "conv2": init_norm_gat_conv(k2, hidden_channels * num_heads,
                                    hidden_channels, 2),
        "conv3": init_norm_gat_conv(k3, hidden_channels * num_heads,
                                    hidden_channels, 2),
        "lin_w": _glorot(k4, (3 * hidden_channels * num_heads, out_channels),
                         3 * hidden_channels * num_heads + out_channels),
        "lin_b": jnp.zeros((out_channels,), jnp.float32),
    }


# ----------------------------------------------------------------------------
# Pure-JAX reference (for a correctness check of the fused kernel)
# ----------------------------------------------------------------------------

def _reference_forward(params, x0, mask, *, hidden_channels, num_heads=2,
                       negative_slope=0.2):
    maskf = (mask != 0).astype(jnp.float32)

    def conv(x, p, heads, out_ch):
        xw = x @ p["w"]
        outs = []
        for h in range(heads):
            xh = xw[:, h * out_ch:(h + 1) * out_ch]
            ai = jnp.sum(xh * p["att_i"][h], axis=-1)
            aj = jnp.sum(xh * p["att_j"][h], axis=-1)
            s = ai[:, None] + aj[None, :]
            s = jnp.where(s >= 0, s, negative_slope * s)
            s = jnp.where(maskf > 0, s, -1e30)
            e = jnp.exp(s - s.max(-1, keepdims=True)) * maskf
            attn = e / jnp.maximum(e.sum(-1, keepdims=True), 1e-30)
            outs.append(attn @ xh)
        return jnp.concatenate(outs, -1) + p["bias"]

    x1 = jax.nn.relu(conv(x0, params["conv1"], num_heads, hidden_channels))
    x2 = jax.nn.relu(conv(x1, params["conv2"], 2, hidden_channels))
    x3 = jax.nn.relu(conv(x2, params["conv3"], 2, hidden_channels))
    xcat = jnp.concatenate([x1, x2, x3], -1)
    return xcat @ params["lin_w"] + params["lin_b"], x1 + x2 + x3


# ----------------------------------------------------------------------------
# Example
# ----------------------------------------------------------------------------

if __name__ == "__main__":
    N = 16            # nodes
    IN_CH = 8
    HIDDEN = 8
    OUT_CH = 4
    HEADS = 2

    key = jax.random.PRNGKey(0)
    k_x, k_p = jax.random.split(key)

    x0 = jax.random.normal(k_x, (N, IN_CH), jnp.float32)

    # small deterministic graph: ring edges (both directions) + self loops
    idx = jnp.arange(N)
    src = jnp.concatenate([idx, idx, idx])
    dst = jnp.concatenate([(idx + 1) % N, (idx - 1) % N, idx])
    edge_index = jnp.stack([src, dst], axis=0)          # (2, E)
    mask = edge_index_to_mask(edge_index, N)            # int8 (N, N)

    params = init_gatnet(k_p, IN_CH, HIDDEN, OUT_CH, num_heads=HEADS)

    fwd = jax.jit(functools.partial(gatnet_forward,
                                    hidden_channels=HIDDEN, num_heads=HEADS))
    x_out, node_emb = fwd(params, x0, mask)
    jax.block_until_ready((x_out, node_emb))

    assert x_out.shape == (N, OUT_CH)
    assert node_emb.shape == (N, HEADS * HIDDEN)

    # correctness vs pure-JAX reference (generous tol for approx reciprocal)
    ref_out, ref_emb = _reference_forward(params, x0, mask,
                                          hidden_channels=HIDDEN,
                                          num_heads=HEADS)
    err = max(float(jnp.max(jnp.abs(x_out - ref_out))),
              float(jnp.max(jnp.abs(node_emb - ref_emb))))
    assert err < 5e-2, f"mismatch vs reference: {err}"

    print("KERNEL_OK")
</pallas_src>

<mosaic_0001>
module attributes {stable_mosaic.version = 11 : i64} {
  func.func @_gatnet_kernel(%arg0: memref<16x8xf32, #tpu.memory_space<vmem>>, %arg1: memref<16x16xi8, #tpu.memory_space<vmem>>, %arg2: memref<8x16xf32, #tpu.memory_space<vmem>>, %arg3: memref<16x4xf32, #tpu.memory_space<vmem>>, %arg4: memref<1x16xf32, #tpu.memory_space<vmem>>, %arg5: memref<16x16xf32, #tpu.memory_space<vmem>>, %arg6: memref<16x4xf32, #tpu.memory_space<vmem>>, %arg7: memref<1x16xf32, #tpu.memory_space<vmem>>, %arg8: memref<16x16xf32, #tpu.memory_space<vmem>>, %arg9: memref<16x4xf32, #tpu.memory_space<vmem>>, %arg10: memref<1x16xf32, #tpu.memory_space<vmem>>, %arg11: memref<48x4xf32, #tpu.memory_space<vmem>>, %arg12: memref<1x4xf32, #tpu.memory_space<vmem>>, %arg13: memref<16x4xf32, #tpu.memory_space<vmem>>, %arg14: memref<16x16xf32, #tpu.memory_space<vmem>>) attributes {dimension_semantics = [], scalar_prefetch = 0 : i64, scratch_operands = 0 : i64, tpu.core_type = #tpu.core_type<tc>} {
    %c0 = arith.constant 0 : index
    %c0_0 = arith.constant 0 : index
    %0 = vector.load %arg1[%c0, %c0_0] : memref<16x16xi8, #tpu.memory_space<vmem>>, vector<16x16xi8>
    %1 = arith.extsi %0 : vector<16x16xi8> to vector<16x16xi32>
    %c0_i32 = arith.constant 0 : i32
    %2 = vector.broadcast %c0_i32 : i32 to vector<16x16xi32>
    %3 = arith.cmpi ne, %1, %2 : vector<16x16xi32>
    %c0_1 = arith.constant 0 : index
    %c0_2 = arith.constant 0 : index
    %4 = vector.load %arg0[%c0_1, %c0_2] : memref<16x8xf32, #tpu.memory_space<vmem>>, vector<16x8xf32>
    %c0_3 = arith.constant 0 : index
    %c0_4 = arith.constant 0 : index
    %5 = vector.load %arg2[%c0_3, %c0_4] : memref<8x16xf32, #tpu.memory_space<vmem>>, vector<8x16xf32>
    %c0_5 = arith.constant 0 : index
    %c0_6 = arith.constant 0 : index
    %6 = vector.load %arg3[%c0_5, %c0_6] : memref<16x4xf32, #tpu.memory_space<vmem>>, vector<16x4xf32>
    %c0_7 = arith.constant 0 : index
    %c0_8 = arith.constant 0 : index
    %7 = vector.load %arg4[%c0_7, %c0_8] : memref<1x16xf32, #tpu.memory_space<vmem>>, vector<1x16xf32>
    %cst = arith.constant dense<0.000000e+00> : vector<16x16xf32>
    %8 = tpu.matmul %4, %5, %cst {dimension_numbers = #tpu.dot_dimension_numbers<[1], [0], [0], [1], [0, 0, 1, 1], [], []>} : vector<16x8xf32>, vector<8x16xf32>, vector<16x16xf32> -> vector<16x16xf32>
    %cst_9 = arith.constant dense<0.000000e+00> : vector<16x4xf32>
    %9 = tpu.matmul %8, %6, %cst_9 {dimension_numbers = #tpu.dot_dimension_numbers<[1], [0], [0], [1], [0, 0, 1, 1], [], []>} : vector<16x16xf32>, vector<16x4xf32>, vector<16x4xf32> -> vector<16x4xf32>
    %10 = vector.extract_strided_slice %9 {offsets = [0, 0], sizes = [16, 1], strides = [1, 1]} : vector<16x4xf32> to vector<16x1xf32>
    %11 = vector.shape_cast %10 : vector<16x1xf32> to vector<16xf32>
    %12 = vector.extract_strided_slice %9 {offsets = [0, 2], sizes = [16, 1], strides = [1, 1]} : vector<16x4xf32> to vector<16x1xf32>
    %13 = vector.shape_cast %12 : vector<16x1xf32> to vector<16xf32>
    %14 = vector.shape_cast %11 : vector<16xf32> to vector<16x1xf32>
    %15 = vector.shape_cast %13 : vector<16xf32> to vector<1x16xf32>
    %16 = vector.broadcast %14 : vector<16x1xf32> to vector<16x16xf32>
    %17 = vector.broadcast %15 : vector<1x16xf32> to vector<16x16xf32>
    %18 = arith.addf %16, %17 : vector<16x16xf32>
    %cst_10 = arith.constant 0.000000e+00 : f32
    %19 = vector.broadcast %cst_10 : f32 to vector<16x16xf32>
    %20 = arith.cmpf oge, %18, %19 : vector<16x16xf32>
    %cst_11 = arith.constant 2.000000e-01 : f32
    %21 = vector.broadcast %cst_11 : f32 to vector<16x16xf32>
    %22 = arith.mulf %21, %18 : vector<16x16xf32>
    %23 = arith.select %20, %18, %22 : vector<16x16xi1>, vector<16x16xf32>
    %cst_12 = arith.constant -1.000000e+30 : f32
    %24 = vector.broadcast %cst_12 : f32 to vector<16x16xf32>
    %25 = arith.select %3, %23, %24 : vector<16x16xi1>, vector<16x16xf32>
    %cst_13 = arith.constant dense<0xFF800000> : vector<16xf32>
    %26 = vector.multi_reduction <maximumf>, %25, %cst_13 [1] : vector<16x16xf32> to vector<16xf32>
    %27 = vector.shape_cast %26 : vector<16xf32> to vector<16x1xf32>
    %28 = vector.broadcast %27 : vector<16x1xf32> to vector<16x16xf32>
    %29 = arith.subf %25, %28 : vector<16x16xf32>
    %30 = math.exp %29 : vector<16x16xf32>
    %cst_14 = arith.constant 0.000000e+00 : f32
    %31 = vector.broadcast %cst_14 : f32 to vector<16x16xf32>
    %32 = arith.select %3, %30, %31 : vector<16x16xi1>, vector<16x16xf32>
    %cst_15 = arith.constant dense<0.000000e+00> : vector<16xf32>
    %33 = vector.multi_reduction <add>, %32, %cst_15 [1] : vector<16x16xf32> to vector<16xf32>
    %34 = vector.shape_cast %33 : vector<16xf32> to vector<16x1xf32>
    %cst_16 = arith.constant 1.000000e-30 : f32
    %35 = vector.broadcast %cst_16 : f32 to vector<16x1xf32>
    %36 = arith.maximumf %34, %35 : vector<16x1xf32>
    %37 = tpu.reciprocal %36 {approx = true} : vector<16x1xf32> -> vector<16x1xf32>
    %38 = vector.broadcast %37 : vector<16x1xf32> to vector<16x16xf32>
    %39 = arith.mulf %32, %38 : vector<16x16xf32>
    %40 = vector.extract_strided_slice %8 {offsets = [0, 0], sizes = [16, 8], strides = [1, 1]} : vector<16x16xf32> to vector<16x8xf32>
    %cst_17 = arith.constant dense<0.000000e+00> : vector<16x8xf32>
    %41 = tpu.matmul %39, %40, %cst_17 {dimension_numbers = #tpu.dot_dimension_numbers<[1], [0], [0], [1], [0, 0, 1, 1], [], []>} : vector<16x16xf32>, vector<16x8xf32>, vector<16x8xf32> -> vector<16x8xf32>
    %42 = vector.extract_strided_slice %9 {offsets = [0, 1], sizes = [16, 1], strides = [1, 1]} : vector<16x4xf32> to vector<16x1xf32>
    %43 = vector.shape_cast %42 : vector<16x1xf32> to vector<16xf32>
    %44 = vector.extract_strided_slice %9 {offsets = [0, 3], sizes = [16, 1], strides = [1, 1]} : vector<16x4xf32> to vector<16x1xf32>
    %45 = vector.shape_cast %44 : vector<16x1xf32> to vector<16xf32>
    %46 = vector.shape_cast %43 : vector<16xf32> to vector<16x1xf32>
    %47 = vector.shape_cast %45 : vector<16xf32> to vector<1x16xf32>
    %48 = vector.broadcast %46 : vector<16x1xf32> to vector<16x16xf32>
    %49 = vector.broadcast %47 : vector<1x16xf32> to vector<16x16xf32>
    %50 = arith.addf %48, %49 : vector<16x16xf32>
    %cst_18 = arith.constant 0.000000e+00 : f32
    %51 = vector.broadcast %cst_18 : f32 to vector<16x16xf32>
    %52 = arith.cmpf oge, %50, %51 : vector<16x16xf32>
    %cst_19 = arith.constant 2.000000e-01 : f32
    %53 = vector.broadcast %cst_19 : f32 to vector<16x16xf32>
    %54 = arith.mulf %53, %50 : vector<16x16xf32>
    %55 = arith.select %52, %50, %54 : vector<16x16xi1>, vector<16x16xf32>
    %cst_20 = arith.constant -1.000000e+30 : f32
    %56 = vector.broadcast %cst_20 : f32 to vector<16x16xf32>
    %57 = arith.select %3, %55, %56 : vector<16x16xi1>, vector<16x16xf32>
    %cst_21 = arith.constant dense<0xFF800000> : vector<16xf32>
    %58 = vector.multi_reduction <maximumf>, %57, %cst_21 [1] : vector<16x16xf32> to vector<16xf32>
    %59 = vector.shape_cast %58 : vector<16xf32> to vector<16x1xf32>
    %60 = vector.broadcast %59 : vector<16x1xf32> to vector<16x16xf32>
    %61 = arith.subf %57, %60 : vector<16x16xf32>
    %62 = math.exp %61 : vector<16x16xf32>
    %cst_22 = arith.constant 0.000000e+00 : f32
    %63 = vector.broadcast %cst_22 : f32 to vector<16x16xf32>
    %64 = arith.select %3, %62, %63 : vector<16x16xi1>, vector<16x16xf32>
    %cst_23 = arith.constant dense<0.000000e+00> : vector<16xf32>
    %65 = vector.multi_reduction <add>, %64, %cst_23 [1] : vector<16x16xf32> to vector<16xf32>
    %66 = vector.shape_cast %65 : vector<16xf32> to vector<16x1xf32>
    %cst_24 = arith.constant 1.000000e-30 : f32
    %67 = vector.broadcast %cst_24 : f32 to vector<16x1xf32>
    %68 = arith.maximumf %66, %67 : vector<16x1xf32>
    %69 = tpu.reciprocal %68 {approx = true} : vector<16x1xf32> -> vector<16x1xf32>
    %70 = vector.broadcast %69 : vector<16x1xf32> to vector<16x16xf32>
    %71 = arith.mulf %64, %70 : vector<16x16xf32>
    %72 = vector.extract_strided_slice %8 {offsets = [0, 8], sizes = [16, 8], strides = [1, 1]} : vector<16x16xf32> to vector<16x8xf32>
    %cst_25 = arith.constant dense<0.000000e+00> : vector<16x8xf32>
    %73 = tpu.matmul %71, %72, %cst_25 {dimension_numbers = #tpu.dot_dimension_numbers<[1], [0], [0], [1], [0, 0, 1, 1], [], []>} : vector<16x16xf32>, vector<16x8xf32>, vector<16x8xf32> -> vector<16x8xf32>
    %74 = tpu.concatenate %41, %73 in 1 : vector<16x8xf32>, vector<16x8xf32> -> vector<16x16xf32>
    %75 = vector.broadcast %7 : vector<1x16xf32> to vector<16x16xf32>
    %76 = arith.addf %74, %75 : vector<16x16xf32>
    %cst_26 = arith.constant 0.000000e+00 : f32
    %77 = vector.broadcast %cst_26 : f32 to vector<16x16xf32>
    %78 = arith.maximumf %76, %77 : vector<16x16xf32>
    %c0_27 = arith.constant 0 : index
    %c0_28 = arith.constant 0 : index
    %79 = vector.load %arg5[%c0_27, %c0_28] : memref<16x16xf32, #tpu.memory_space<vmem>>, vector<16x16xf32>
    %c0_29 = arith.constant 0 : index
    %c0_30 = arith.constant 0 : index
    %80 = vector.load %arg6[%c0_29, %c0_30] : memref<16x4xf32, #tpu.memory_space<vmem>>, vector<16x4xf32>
    %c0_31 = arith.constant 0 : index
    %c0_32 = arith.constant 0 : index
    %81 = vector.load %arg7[%c0_31, %c0_32] : memref<1x16xf32, #tpu.memory_space<vmem>>, vector<1x16xf32>
    %cst_33 = arith.constant dense<0.000000e+00> : vector<16x16xf32>
    %82 = tpu.matmul %78, %79, %cst_33 {dimension_numbers = #tpu.dot_dimension_numbers<[1], [0], [0], [1], [0, 0, 1, 1], [], []>} : vector<16x16xf32>, vector<16x16xf32>, vector<16x16xf32> -> vector<16x16xf32>
    %cst_34 = arith.constant dense<0.000000e+00> : vector<16x4xf32>
    %83 = tpu.matmul %82, %80, %cst_34 {dimension_numbers = #tpu.dot_dimension_numbers<[1], [0], [0], [1], [0, 0, 1, 1], [], []>} : vector<16x16xf32>, vector<16x4xf32>, vector<16x4xf32> -> vector<16x4xf32>
    %84 = vector.extract_strided_slice %83 {offsets = [0, 0], sizes = [16, 1], strides = [1, 1]} : vector<16x4xf32> to vector<16x1xf32>
    %85 = vector.shape_cast %84 : vector<16x1xf32> to vector<16xf32>
    %86 = vector.extract_strided_slice %83 {offsets = [0, 2], sizes = [16, 1], strides = [1, 1]} : vector<16x4xf32> to vector<16x1xf32>
    %87 = vector.shape_cast %86 : vector<16x1xf32> to vector<16xf32>
    %88 = vector.shape_cast %85 : vector<16xf32> to vector<16x1xf32>
    %89 = vector.shape_cast %87 : vector<16xf32> to vector<1x16xf32>
    %90 = vector.broadcast %88 : vector<16x1xf32> to vector<16x16xf32>
    %91 = vector.broadcast %89 : vector<1x16xf32> to vector<16x16xf32>
    %92 = arith.addf %90, %91 : vector<16x16xf32>
    %cst_35 = arith.constant 0.000000e+00 : f32
    %93 = vector.broadcast %cst_35 : f32 to vector<16x16xf32>
    %94 = arith.cmpf oge, %92, %93 : vector<16x16xf32>
    %cst_36 = arith.constant 2.000000e-01 : f32
    %95 = vector.broadcast %cst_36 : f32 to vector<16x16xf32>
    %96 = arith.mulf %95, %92 : vector<16x16xf32>
    %97 = arith.select %94, %92, %96 : vector<16x16xi1>, vector<16x16xf32>
    %cst_37 = arith.constant -1.000000e+30 : f32
    %98 = vector.broadcast %cst_37 : f32 to vector<16x16xf32>
    %99 = arith.select %3, %97, %98 : vector<16x16xi1>, vector<16x16xf32>
    %cst_38 = arith.constant dense<0xFF800000> : vector<16xf32>
    %100 = vector.multi_reduction <maximumf>, %99, %cst_38 [1] : vector<16x16xf32> to vector<16xf32>
    %101 = vector.shape_cast %100 : vector<16xf32> to vector<16x1xf32>
    %102 = vector.broadcast %101 : vector<16x1xf32> to vector<16x16xf32>
    %103 = arith.subf %99, %102 : vector<16x16xf32>
    %104 = math.exp %103 : vector<16x16xf32>
    %cst_39 = arith.constant 0.000000e+00 : f32
    %105 = vector.broadcast %cst_39 : f32 to vector<16x16xf32>
    %106 = arith.select %3, %104, %105 : vector<16x16xi1>, vector<16x16xf32>
    %cst_40 = arith.constant dense<0.000000e+00> : vector<16xf32>
    %107 = vector.multi_reduction <add>, %106, %cst_40 [1] : vector<16x16xf32> to vector<16xf32>
    %108 = vector.shape_cast %107 : vector<16xf32> to vector<16x1xf32>
    %cst_41 = arith.constant 1.000000e-30 : f32
    %109 = vector.broadcast %cst_41 : f32 to vector<16x1xf32>
    %110 = arith.maximumf %108, %109 : vector<16x1xf32>
    %111 = tpu.reciprocal %110 {approx = true} : vector<16x1xf32> -> vector<16x1xf32>
    %112 = vector.broadcast %111 : vector<16x1xf32> to vector<16x16xf32>
    %113 = arith.mulf %106, %112 : vector<16x16xf32>
    %114 = vector.extract_strided_slice %82 {offsets = [0, 0], sizes = [16, 8], strides = [1, 1]} : vector<16x16xf32> to vector<16x8xf32>
    %cst_42 = arith.constant dense<0.000000e+00> : vector<16x8xf32>
    %115 = tpu.matmul %113, %114, %cst_42 {dimension_numbers = #tpu.dot_dimension_numbers<[1], [0], [0], [1], [0, 0, 1, 1], [], []>} : vector<16x16xf32>, vector<16x8xf32>, vector<16x8xf32> -> vector<16x8xf32>
    %116 = vector.extract_strided_slice %83 {offsets = [0, 1], sizes = [16, 1], strides = [1, 1]} : vector<16x4xf32> to vector<16x1xf32>
    %117 = vector.shape_cast %116 : vector<16x1xf32> to vector<16xf32>
    %118 = vector.extract_strided_slice %83 {offsets = [0, 3], sizes = [16, 1], strides = [1, 1]} : vector<16x4xf32> to vector<16x1xf32>
    %119 = vector.shape_cast %118 : vector<16x1xf32> to vector<16xf32>
    %120 = vector.shape_cast %117 : vector<16xf32> to vector<16x1xf32>
    %121 = vector.shape_cast %119 : vector<16xf32> to vector<1x16xf32>
    %122 = vector.broadcast %120 : vector<16x1xf32> to vector<16x16xf32>
    %123 = vector.broadcast %121 : vector<1x16xf32> to vector<16x16xf32>
    %124 = arith.addf %122, %123 : vector<16x16xf32>
    %cst_43 = arith.constant 0.000000e+00 : f32
    %125 = vector.broadcast %cst_43 : f32 to vector<16x16xf32>
    %126 = arith.cmpf oge, %124, %125 : vector<16x16xf32>
    %cst_44 = arith.constant 2.000000e-01 : f32
    %127 = vector.broadcast %cst_44 : f32 to vector<16x16xf32>
    %128 = arith.mulf %127, %124 : vector<16x16xf32>
    %129 = arith.select %126, %124, %128 : vector<16x16xi1>, vector<16x16xf32>
    %cst_45 = arith.constant -1.000000e+30 : f32
    %130 = vector.broadcast %cst_45 : f32 to vector<16x16xf32>
    %131 = arith.select %3, %129, %130 : vector<16x16xi1>, vector<16x16xf32>
    %cst_46 = arith.constant dense<0xFF800000> : vector<16xf32>
    %132 = vector.multi_reduction <maximumf>, %131, %cst_46 [1] : vector<16x16xf32> to vector<16xf32>
    %133 = vector.shape_cast %132 : vector<16xf32> to vector<16x1xf32>
    %134 = vector.broadcast %133 : vector<16x1xf32> to vector<16x16xf32>
    %135 = arith.subf %131, %134 : vector<16x16xf32>
    %136 = math.exp %135 : vector<16x16xf32>
    %cst_47 = arith.constant 0.000000e+00 : f32
    %137 = vector.broadcast %cst_47 : f32 to vector<16x16xf32>
    %138 = arith.select %3, %136, %137 : vector<16x16xi1>, vector<16x16xf32>
    %cst_48 = arith.constant dense<0.000000e+00> : vector<16xf32>
    %139 = vector.multi_reduction <add>, %138, %cst_48 [1] : vector<16x16xf32> to vector<16xf32>
    %140 = vector.shape_cast %139 : vector<16xf32> to vector<16x1xf32>
    %cst_49 = arith.constant 1.000000e-30 : f32
    %141 = vector.broadcast %cst_49 : f32 to vector<16x1xf32>
    %142 = arith.maximumf %140, %141 : vector<16x1xf32>
    %143 = tpu.reciprocal %142 {approx = true} : vector<16x1xf32> -> vector<16x1xf32>
    %144 = vector.broadcast %143 : vector<16x1xf32> to vector<16x16xf32>
    %145 = arith.mulf %138, %144 : vector<16x16xf32>
    %146 = vector.extract_strided_slice %82 {offsets = [0, 8], sizes = [16, 8], strides = [1, 1]} : vector<16x16xf32> to vector<16x8xf32>
    %cst_50 = arith.constant dense<0.000000e+00> : vector<16x8xf32>
    %147 = tpu.matmul %145, %146, %cst_50 {dimension_numbers = #tpu.dot_dimension_numbers<[1], [0], [0], [1], [0, 0, 1, 1], [], []>} : vector<16x16xf32>, vector<16x8xf32>, vector<16x8xf32> -> vector<16x8xf32>
    %148 = tpu.concatenate %115, %147 in 1 : vector<16x8xf32>, vector<16x8xf32> -> vector<16x16xf32>
    %149 = vector.broadcast %81 : vector<1x16xf32> to vector<16x16xf32>
    %150 = arith.addf %148, %149 : vector<16x16xf32>
    %cst_51 = arith.constant 0.000000e+00 : f32
    %151 = vector.broadcast %cst_51 : f32 to vector<16x16xf32>
    %152 = arith.maximumf %150, %151 : vector<16x16xf32>
    %c0_52 = arith.constant 0 : index
    %c0_53 = arith.constant 0 : index
    %153 = vector.load %arg8[%c0_52, %c0_53] : memref<16x16xf32, #tpu.memory_space<vmem>>, vector<16x16xf32>
    %c0_54 = arith.constant 0 : index
    %c0_55 = arith.constant 0 : index
    %154 = vector.load %arg9[%c0_54, %c0_55] : memref<16x4xf32, #tpu.memory_space<vmem>>, vector<16x4xf32>
    %c0_56 = arith.constant 0 : index
    %c0_57 = arith.constant 0 : index
    %155 = vector.load %arg10[%c0_56, %c0_57] : memref<1x16xf32, #tpu.memory_space<vmem>>, vector<1x16xf32>
    %cst_58 = arith.constant dense<0.000000e+00> : vector<16x16xf32>
    %156 = tpu.matmul %152, %153, %cst_58 {dimension_numbers = #tpu.dot_dimension_numbers<[1], [0], [0], [1], [0, 0, 1, 1], [], []>} : vector<16x16xf32>, vector<16x16xf32>, vector<16x16xf32> -> vector<16x16xf32>
    %cst_59 = arith.constant dense<0.000000e+00> : vector<16x4xf32>
    %157 = tpu.matmul %156, %154, %cst_59 {dimension_numbers = #tpu.dot_dimension_numbers<[1], [0], [0], [1], [0, 0, 1, 1], [], []>} : vector<16x16xf32>, vector<16x4xf32>, vector<16x4xf32> -> vector<16x4xf32>
    %158 = vector.extract_strided_slice %157 {offsets = [0, 0], sizes = [16, 1], strides = [1, 1]} : vector<16x4xf32> to vector<16x1xf32>
    %159 = vector.shape_cast %158 : vector<16x1xf32> to vector<16xf32>
    %160 = vector.extract_strided_slice %157 {offsets = [0, 2], sizes = [16, 1], strides = [1, 1]} : vector<16x4xf32> to vector<16x1xf32>
    %161 = vector.shape_cast %160 : vector<16x1xf32> to vector<16xf32>
    %162 = vector.shape_cast %159 : vector<16xf32> to vector<16x1xf32>
    %163 = vector.shape_cast %161 : vector<16xf32> to vector<1x16xf32>
    %164 = vector.broadcast %162 : vector<16x1xf32> to vector<16x16xf32>
    %165 = vector.broadcast %163 : vector<1x16xf32> to vector<16x16xf32>
    %166 = arith.addf %164, %165 : vector<16x16xf32>
    %cst_60 = arith.constant 0.000000e+00 : f32
    %167 = vector.broadcast %cst_60 : f32 to vector<16x16xf32>
    %168 = arith.cmpf oge, %166, %167 : vector<16x16xf32>
    %cst_61 = arith.constant 2.000000e-01 : f32
    %169 = vector.broadcast %cst_61 : f32 to vector<16x16xf32>
    %170 = arith.mulf %169, %166 : vector<16x16xf32>
    %171 = arith.select %168, %166, %170 : vector<16x16xi1>, vector<16x16xf32>
    %cst_62 = arith.constant -1.000000e+30 : f32
    %172 = vector.broadcast %cst_62 : f32 to vector<16x16xf32>
    %173 = arith.select %3, %171, %172 : vector<16x16xi1>, vector<16x16xf32>
    %cst_63 = arith.constant dense<0xFF800000> : vector<16xf32>
    %174 = vector.multi_reduction <maximumf>, %173, %cst_63 [1] : vector<16x16xf32> to vector<16xf32>
    %175 = vector.shape_cast %174 : vector<16xf32> to vector<16x1xf32>
    %176 = vector.broadcast %175 : vector<16x1xf32> to vector<16x16xf32>
    %177 = arith.subf %173, %176 : vector<16x16xf32>
    %178 = math.exp %177 : vector<16x16xf32>
    %cst_64 = arith.constant 0.000000e+00 : f32
    %179 = vector.broadcast %cst_64 : f32 to vector<16x16xf32>
    %180 = arith.select %3, %178, %179 : vector<16x16xi1>, vector<16x16xf32>
    %cst_65 = arith.constant dense<0.000000e+00> : vector<16xf32>
    %181 = vector.multi_reduction <add>, %180, %cst_65 [1] : vector<16x16xf32> to vector<16xf32>
    %182 = vector.shape_cast %181 : vector<16xf32> to vector<16x1xf32>
    %cst_66 = arith.constant 1.000000e-30 : f32
    %183 = vector.broadcast %cst_66 : f32 to vector<16x1xf32>
    %184 = arith.maximumf %182, %183 : vector<16x1xf32>
    %185 = tpu.reciprocal %184 {approx = true} : vector<16x1xf32> -> vector<16x1xf32>
    %186 = vector.broadcast %185 : vector<16x1xf32> to vector<16x16xf32>
    %187 = arith.mulf %180, %186 : vector<16x16xf32>
    %188 = vector.extract_strided_slice %156 {offsets = [0, 0], sizes = [16, 8], strides = [1, 1]} : vector<16x16xf32> to vector<16x8xf32>
    %cst_67 = arith.constant dense<0.000000e+00> : vector<16x8xf32>
    %189 = tpu.matmul %187, %188, %cst_67 {dimension_numbers = #tpu.dot_dimension_numbers<[1], [0], [0], [1], [0, 0, 1, 1], [], []>} : vector<16x16xf32>, vector<16x8xf32>, vector<16x8xf32> -> vector<16x8xf32>
    %190 = vector.extract_strided_slice %157 {offsets = [0, 1], sizes = [16, 1], strides = [1, 1]} : vector<16x4xf32> to vector<16x1xf32>
    %191 = vector.shape_cast %190 : vector<16x1xf32> to vector<16xf32>
    %192 = vector.extract_strided_slice %157 {offsets = [0, 3], sizes = [16, 1], strides = [1, 1]} : vector<16x4xf32> to vector<16x1xf32>
    %193 = vector.shape_cast %192 : vector<16x1xf32> to vector<16xf32>
    %194 = vector.shape_cast %191 : vector<16xf32> to vector<16x1xf32>
    %195 = vector.shape_cast %193 : vector<16xf32> to vector<1x16xf32>
    %196 = vector.broadcast %194 : vector<16x1xf32> to vector<16x16xf32>
    %197 = vector.broadcast %195 : vector<1x16xf32> to vector<16x16xf32>
    %198 = arith.addf %196, %197 : vector<16x16xf32>
    %cst_68 = arith.constant 0.000000e+00 : f32
    %199 = vector.broadcast %cst_68 : f32 to vector<16x16xf32>
    %200 = arith.cmpf oge, %198, %199 : vector<16x16xf32>
    %cst_69 = arith.constant 2.000000e-01 : f32
    %201 = vector.broadcast %cst_69 : f32 to vector<16x16xf32>
    %202 = arith.mulf %201, %198 : vector<16x16xf32>
    %203 = arith.select %200, %198, %202 : vector<16x16xi1>, vector<16x16xf32>
    %cst_70 = arith.constant -1.000000e+30 : f32
    %204 = vector.broadcast %cst_70 : f32 to vector<16x16xf32>
    %205 = arith.select %3, %203, %204 : vector<16x16xi1>, vector<16x16xf32>
    %cst_71 = arith.constant dense<0xFF800000> : vector<16xf32>
    %206 = vector.multi_reduction <maximumf>, %205, %cst_71 [1] : vector<16x16xf32> to vector<16xf32>
    %207 = vector.shape_cast %206 : vector<16xf32> to vector<16x1xf32>
    %208 = vector.broadcast %207 : vector<16x1xf32> to vector<16x16xf32>
    %209 = arith.subf %205, %208 : vector<16x16xf32>
    %210 = math.exp %209 : vector<16x16xf32>
    %cst_72 = arith.constant 0.000000e+00 : f32
    %211 = vector.broadcast %cst_72 : f32 to vector<16x16xf32>
    %212 = arith.select %3, %210, %211 : vector<16x16xi1>, vector<16x16xf32>
    %cst_73 = arith.constant dense<0.000000e+00> : vector<16xf32>
    %213 = vector.multi_reduction <add>, %212, %cst_73 [1] : vector<16x16xf32> to vector<16xf32>
    %214 = vector.shape_cast %213 : vector<16xf32> to vector<16x1xf32>
    %cst_74 = arith.constant 1.000000e-30 : f32
    %215 = vector.broadcast %cst_74 : f32 to vector<16x1xf32>
    %216 = arith.maximumf %214, %215 : vector<16x1xf32>
    %217 = tpu.reciprocal %216 {approx = true} : vector<16x1xf32> -> vector<16x1xf32>
    %218 = vector.broadcast %217 : vector<16x1xf32> to vector<16x16xf32>
    %219 = arith.mulf %212, %218 : vector<16x16xf32>
    %220 = vector.extract_strided_slice %156 {offsets = [0, 8], sizes = [16, 8], strides = [1, 1]} : vector<16x16xf32> to vector<16x8xf32>
    %cst_75 = arith.constant dense<0.000000e+00> : vector<16x8xf32>
    %221 = tpu.matmul %219, %220, %cst_75 {dimension_numbers = #tpu.dot_dimension_numbers<[1], [0], [0], [1], [0, 0, 1, 1], [], []>} : vector<16x16xf32>, vector<16x8xf32>, vector<16x8xf32> -> vector<16x8xf32>
    %222 = tpu.concatenate %189, %221 in 1 : vector<16x8xf32>, vector<16x8xf32> -> vector<16x16xf32>
    %223 = vector.broadcast %155 : vector<1x16xf32> to vector<16x16xf32>
    %224 = arith.addf %222, %223 : vector<16x16xf32>
    %cst_76 = arith.constant 0.000000e+00 : f32
    %225 = vector.broadcast %cst_76 : f32 to vector<16x16xf32>
    %226 = arith.maximumf %224, %225 : vector<16x16xf32>
    %227 = tpu.concatenate %78, %152, %226 in 1 : vector<16x16xf32>, vector<16x16xf32>, vector<16x16xf32> -> vector<16x48xf32>
    %c0_77 = arith.constant 0 : index
    %c0_78 = arith.constant 0 : index
    %228 = vector.load %arg11[%c0_77, %c0_78] : memref<48x4xf32, #tpu.memory_space<vmem>>, vector<48x4xf32>
    %cst_79 = arith.constant dense<0.000000e+00> : vector<16x4xf32>
    %229 = tpu.matmul %227, %228, %cst_79 {dimension_numbers = #tpu.dot_dimension_numbers<[1], [0], [0], [1], [0, 0, 1, 1], [], []>} : vector<16x48xf32>, vector<48x4xf32>, vector<16x4xf32> -> vector<16x4xf32>
    %c0_80 = arith.constant 0 : index
    %c0_81 = arith.constant 0 : index
    %230 = vector.load %arg12[%c0_80, %c0_81] : memref<1x4xf32, #tpu.memory_space<vmem>>, vector<1x4xf32>
    %231 = vector.broadcast %230 : vector<1x4xf32> to vector<16x4xf32>
    %232 = arith.addf %229, %231 : vector<16x4xf32>
    %c0_82 = arith.constant 0 : index
    %c0_83 = arith.constant 0 : index
    %233 = vector.load %arg13[%c0_82, %c0_83] : memref<16x4xf32, #tpu.memory_space<vmem>>, vector<16x4xf32>
    tpu.vector_store %arg13[%c0_82, %c0_83], %232 {strides = array<i32>} : memref<16x4xf32, #tpu.memory_space<vmem>>, vector<16x4xf32>,
    %234 = arith.addf %78, %152 : vector<16x16xf32>
    %235 = arith.addf %234, %226 : vector<16x16xf32>
    %c0_84 = arith.constant 0 : index
    %c0_85 = arith.constant 0 : index
    %236 = vector.load %arg14[%c0_84, %c0_85] : memref<16x16xf32, #tpu.memory_space<vmem>>, vector<16x16xf32>
    tpu.vector_store %arg14[%c0_84, %c0_85], %235 {strides = array<i32>} : memref<16x16xf32, #tpu.memory_space<vmem>>, vector<16x16xf32>,
    return
  }
}

</mosaic_0001>

<bundles_post_ra>
// kernel: gatnet_forward.1
= control target key start
LH: loop header
LB: loop body
LE: loop exit
PB: predicated region body
PF: predicated region fallthrough
CT: control target
= control target key end

     0   :  { %vm59_vm0 = vcmask 64512   ;;  %s2439_s0 = inlined_call_operand.vmem [shape: f32[16,8], index: 0, kind: input, shape index: {}]   ;;  %s2440_s1 = inlined_call_operand.vmem [shape: s8[16,16], index: 1, kind: input, shape index: {}]   ;;  %s2441_s2 = inlined_call_operand.vmem [shape: f32[8,16], index: 2, kind: input, shape index: {}]   ;;  %s2442_s3 = inlined_call_operand.vmem [shape: f32[16,4], index: 3, kind: input, shape index: {}]   ;;  %s2443_s4 = inlined_call_operand.vmem [shape: f32[1,16], index: 4, kind: input, shape index: {}]   ;;  %s2444_s5 = inlined_call_operand.vmem [shape: f32[16,16], index: 5, kind: input, shape index: {}]   ;;  %s2445_s6 = inlined_call_operand.vmem [shape: f32[16,4], index: 6, kind: input, shape index: {}]   ;;  %s2446_s7 = inlined_call_operand.vmem [shape: f32[1,16], index: 7, kind: input, shape index: {}]   ;;  %s2447_s8 = inlined_call_operand.vmem [shape: f32[16,16], index: 8, kind: input, shape index: {}]   ;;  %s2448_s9 = inlined_call_operand.vmem [shape: f32[16,4], index: 9, kind: input, shape index: {}]   ;;  %s2449_s10 = inlined_call_operand.vmem [shape: f32[1,16], index: 10, kind: input, shape index: {}]   ;;  %s2450_s11 = inlined_call_operand.vmem [shape: f32[48,4], index: 11, kind: input, shape index: {}]   ;;  %s2451_s12 = inlined_call_operand.vmem [shape: f32[1,4], index: 12, kind: input, shape index: {}]   ;;  %s2452_s13 = inlined_call_operand.vmem [shape: f32[16,4], index: 13, kind: output, shape index: {0}]   ;;  %s2453_s14 = inlined_call_operand.hbm [shape: f32[16,16], index: 14, kind: output, shape index: {1}]  }
   0x1   :  { %v55_v0 = vld [vmem:[%s2441_s2] sm:$0xff]  ;;  %v54_v2 = vld [vmem:[%s2439_s0 + $0x8] sm:$0xff] }
   0x2   :  { %v53_v1 = vld [vmem:[%s2439_s0] sm:$0xff]  ;;  %1765 = vmatprep.subr.mxu0 %v55_v0  ;;  %v57_v4 = vld [vmem:[%s2442_s3 + $0x8] sm:$0xff] }
   0x3   :  { %1767 = vmatprep.mubr.msk.f32.mxu0 %vm59_vm0, %v53_v1  ;;  %v56_v3 = vld [vmem:[%s2442_s3] sm:$0xff] }
   0x4   :  { %20 = vsyncpa [#allocation3], 0  ;;  %1766 = vmatpush3.msra.mxu0 %v55_v0  ;;  %v1862_v5 = vpack.c.bf16 %v57_v4, %v56_v3  ;;  %v2037_v6 = vmov 2   ;;  %v2038_v7 = vmov 0   ;;  %vm141_vm1 = vcmask 130048   ;;  %s2042_s30 = smov 8  }
   0x5   :  { %1768 = vmatmul.mubr.msk.f32.vlgmr.msra.gmra.mrb[0].mxu0 %vm59_vm0, %v54_v2  ;;  %1928 = vset.pattern.permute.xlu0 %v2037_v6  ;;  %v2039_v14 = vmov 3   ;;  %v2040_v15 = vmov 1   ;;  %v239_v16 = vlaneseq  ;;  %v1707_v24 = vld [vmem:[%s2440_s1] sm:$0xf]   ;;  %vm250_vm2 = vcmask 130112   ;;  %s2041_s1 = smov 120  }
   0x6   :  { %1863 = vmatprep.subr.bf16.mxu1 %v1862_v5  ;;  %1929 = vset.pattern.permute.xlu1 %v2038_v7  ;;  %v1709_v29 = vunpack.c.1.s8 %v1707_v24  ;;  %v1708_v33 = vunpack.c.0.s8 %v1707_v24  ;;  %s2043_s29 = smov 16   ;;  %s2044_s15 = smov 32  }
   0x7   :  { %1865 = vmatpush3.bf16.msra.mxu1 %v1862_v5  ;;  %v240_v17 = vand.u32 127, %v239_v16  ;;  %v242_v18 = vshrl.u32 %v239_v16, 7 }
   0x8   :  { %vm2171_vm3 = vcmp.ne.s32.totalorder %v1709_v29, 0  ;;  %vm2178_vm5 = vcmp.ne.s32.totalorder %v1708_v33, 0 }
   0x9   :  { %v245_v19 = vadd.s32 4294967288, %v240_v17  ;;  %v2162_v23 = vsub.s32 %v240_v17, %v242_v18 }
   0xb   :  { %v2160_v22 = vsub.s32 %v245_v19, %v242_v18 }
  0xd8   :  { %v2141_v8 = vpop.f32.mrb[0].mxu0 }
  0xd9   :  { %v2143_v9 = vpop.f32.mrb[1].mxu0 }
  0xda   :  { %v1935_v10 = vpack.i.bf16 %v2141_v8, %v2143_v9  ;;  %v1866_v11 = vpack.c.bf16 %v2141_v8, %v2143_v9  ;;  %1774 = vmatprep.mubr.msk.f32.mxu1 %vm141_vm1, %v2143_v9 }
  0xdb   :  { %1775 = vmatmul.mubr.msk.f32.vlgmr.msra.gmra.mrb[0].mxu1 %vm141_vm1, %v2141_v8 }
  0xdc   :  { %1867 = vmatprep.subr.bf16.mxu1 %v1866_v11 }
  0xdd   :  { %1869 = vmatpush3.bf16.msra.mxu1 %v1866_v11 }
 0x1ae   :  { %v1776_v12 = vpop.f32.mrb[0].mxu1 }
 0x1af   :  { %230 = vperm.xlu1 %1929, %v1776_v12   ;;  %237 = vperm.xlu0 %1928, %v1776_v12   ;;  %v214_v13 = vpop.f32.mrb[1].mxu1 }
 0x1b3   :  { %1930 = vset.pattern.permute.xlu1 %v2039_v14  ;;  %234 = vperm.xlu0 %1928, %v214_v13  }
 0x1b4   :  { %394 = vperm.xlu1 %1930, %v1776_v12  }
 0x1b7   :  { %1932 = vset.pattern.permute.xlu0 %v2039_v14 }
 0x1b8   :  { %1931 = vset.pattern.permute.xlu1 %v2038_v7  ;;  %391 = vperm.xlu0 %1932, %v214_v13  }
 0x1b9   :  { %225 = vperm.xlu1 %1931, %v214_v13  }
 0x1bc   :  { %1934 = vset.pattern.permute.xlu0 %v2040_v15 }
 0x1bd   :  { %1933 = vset.pattern.permute.xlu1 %v2040_v15  ;;  %387 = vperm.xlu0 %1934, %v1776_v12  }
 0x1be   :  { %383 = vperm.xlu1 %1933, %v214_v13  }
 0x1c1   :  { %1940 = vset.pattern.permute.xlu0 %v2039_v14 }
 0x1c2   :  { %1941 = vset.pattern.permute.xlu1 %v2039_v14 }
 0x22e   :  { %v231_v20 = vpop.permute.xlu1 %230  ;;  %v238_v21 = vpop.permute.xlu0 %237 }
 0x22f   :  { %v249_v26 = vrot.slane %v238_v21, %v2160_v22 }
 0x232   :  { %v235_v25 = vpop.permute.xlu0 %234 }
 0x233   :  { %v244_v27 = vrot.slane %v235_v25, %v2162_v23  ;;  %v395_v28 = vpop.permute.xlu1 %394 }
 0x234   :  { %v403_v39 = vrot.slane %v395_v28, %v2160_v22 }
 0x235   :  { %v251_v30 = vsel %vm250_vm2, %v249_v26, %v244_v27 }
 0x236   :  { %v266_v31 = vadd.f32 %v251_v30, %v231_v20 }
 0x237   :  { %v392_v32 = vpop.permute.xlu0 %391 }
 0x238   :  { %v399_v34 = vrot.slane %v392_v32, %v2162_v23  ;;  %v226_v35 = vpop.permute.xlu1 %225  ;;  %vm268_vm4 = vcmp.ge.f32.partialorder %v266_v31, 0.0  ;;  %v270_v37 = vmul.f32 0.2, %v266_v31 }
 0x239   :  { %v265_v38 = vadd.f32 %v251_v30, %v226_v35 }
 0x23a   :  { %v272_v40 = vsel %vm268_vm4, %v266_v31, %v270_v37  ;;  %v404_v44 = vsel %vm250_vm2, %v403_v39, %v399_v34 }
 0x23b   :  { %v269_v41 = vmul.f32 0.2, %v265_v38  ;;  %v274_v42 = vsel %vm2171_vm3, %v272_v40, -1e+30  ;;  %vm267_vm6 = vcmp.ge.f32.partialorder %v265_v38, 0.0 }
 0x23c   :  { %v388_v45 = vpop.permute.xlu0 %387  ;;  %v278_v46 = vsel %vm141_vm1, %v274_v42, -inf }
 0x23d   :  { %v413_v47 = vadd.f32 %v404_v44, %v388_v45  ;;  %v384_v48 = vpop.permute.xlu1 %383  ;;  %279 = vmax.xlane.f32.xlu0 %v278_v46  ;;  %v271_v49 = vsel %vm267_vm6, %v265_v38, %v269_v41 }
 0x23e   :  { %v412_v50 = vadd.f32 %v404_v44, %v384_v48  ;;  %v273_v51 = vsel %vm2178_vm5, %v271_v49, -1e+30  ;;  %v555_v49 = vld [vmem:[%s2444_s5] sm:$0xff] }
 0x23f   :  { %v417_v52 = vmul.f32 0.2, %v413_v47  ;;  %v275_v53 = vsel %vm141_vm1, %v273_v51, -inf  ;;  %vm415_vm7 = vcmp.ge.f32.partialorder %v413_v47, 0.0 }
 0x240   :  { %v416_v54 = vmul.f32 0.2, %v412_v50  ;;  %276 = vmax.xlane.f32.xlu1 %v275_v53  ;;  %vm414_vm8 = vcmp.ge.f32.partialorder %v412_v50, 0.0  ;;  %v557_v53 = vld [vmem:[%s2445_s6] sm:$0xff] }
 0x241   :  { %v419_v55 = vsel %vm415_vm7, %v413_v47, %v417_v52 }
 0x242   :  { %v421_v56 = vsel %vm2171_vm3, %v419_v55, -1e+30  ;;  %v418_v57 = vsel %vm414_vm8, %v412_v50, %v416_v54  ;;  %v556_v50 = vld [vmem:[%s2444_s5 + $0x8] sm:$0xff] }
 0x243   :  { %v425_v58 = vsel %vm141_vm1, %v421_v56, -inf  ;;  %v420_v59 = vsel %vm2178_vm5, %v418_v57, -1e+30  ;;  %v558_v54 = vld [vmem:[%s2445_s6 + $0x8] sm:$0xff] }
 0x244   :  { %426 = vmax.xlane.f32.xlu0 %v425_v58  ;;  %v422_v60 = vsel %vm141_vm1, %v420_v59, -inf }
 0x245   :  { %423 = vmax.xlane.f32.xlu1 %v422_v60 }
 0x2ca   :  { %v280_v61 = vpop.xlane.xlu0 %279 }
 0x2cb   :  { %v282_v62 = vsub.f32 %v274_v42, %v280_v61 }
 0x2cd   :  { %v285_v63 = vmul.f32 1.442695, %v282_v62  ;;  %v277_v0 = vpop.xlane.xlu1 %276 }
 0x2ce   :  { %v281_v1 = vsub.f32 %v273_v51, %v277_v0  ;;  %v1874_v51 = vpack.c.bf16 %v556_v50, %v555_v49 }
 0x2cf   :  { %1965 = vpow2.f32 %v285_v63 }
 0x2d0   :  { %v283_v2 = vmul.f32 1.442695, %v281_v1  ;;  %1875 = vmatprep.subr.bf16.mxu0 %v1874_v51 }
 0x2d1   :  { %v427_v3 = vpop.xlane.xlu0 %426  ;;  %1877 = vmatpush3.bf16.msra.mxu0 %v1874_v51 }
 0x2d2   :  { %1967 = vpow2.f32 %v283_v2  ;;  %v429_v4 = vsub.f32 %v421_v56, %v427_v3  ;;  %v424_v5 = vpop.xlane.xlu1 %423  ;;  %v1878_v56 = vpack.c.bf16 %v558_v54, %v557_v53 }
 0x2d3   :  { %v428_v11 = vsub.f32 %v420_v59, %v424_v5  ;;  %v1684_v59 = vld [vmem:[%s2443_s4] ss:$0 sm:$0xff] }
 0x2d4   :  { %v432_v12 = vmul.f32 1.442695, %v429_v4 }
 0x2d5   :  { %v430_v13 = vmul.f32 1.442695, %v428_v11 }
 0x2d6   :  { %1969 = vpow2.f32 %v432_v12 }
 0x2d7   :  { %1971 = vpow2.f32 %v430_v13 }
 0x2d9   :  { %v1966_v16 = vpop.eup %1965 }
 0x2da   :  { %v288_v17 = vsel %vm2171_vm3, %v1966_v16, 0.0 }
 0x2db   :  { %v292_v18 = vsel %vm141_vm1, %v288_v17, 0.0 }
 0x2dc   :  { %v1968_v19 = vpop.eup %1967  ;;  %293 = vadd.xlane.f32.xlu0 %v292_v18 }
 0x2dd   :  { %v287_v20 = vsel %vm2178_vm5, %v1968_v19, 0.0 }
 0x2de   :  { %v289_v21 = vsel %vm141_vm1, %v287_v20, 0.0 }
 0x2df   :  { %290 = vadd.xlane.f32.xlu1 %v289_v21 }
 0x2e0   :  { %v1970_v24 = vpop.eup %1969 }
 0x2e1   :  { %v1972_v25 = vpop.eup %1971  ;;  %v435_v26 = vsel %vm2171_vm3, %v1970_v24, 0.0 }
 0x2e2   :  { %v439_v27 = vsel %vm141_vm1, %v435_v26, 0.0  ;;  %v434_v28 = vsel %vm2178_vm5, %v1972_v25, 0.0 }
 0x2e3   :  { %440 = vadd.xlane.f32.xlu0 %v439_v27  ;;  %v436_v29 = vsel %vm141_vm1, %v434_v28, 0.0 }
 0x2e4   :  { %437 = vadd.xlane.f32.xlu1 %v436_v29 }
 0x2f5   :  { %1936 = vrot.lane.b32.xlu1 %v1935_v10, %s2041_s1 }
 0x369   :  { %v294_v30 = vpop.xlane.xlu0 %293 }
 0x36a   :  { %v296_v31 = vmax.f32 %v294_v30, 1e-30 }
 0x36c   :  { %v291_v32 = vpop.xlane.xlu1 %290  ;;  %1973 = vrcp.f32 %v296_v31 }
 0x36d   :  { %v295_v33 = vmax.f32 %v291_v32, 1e-30 }
 0x36f   :  { %1975 = vrcp.f32 %v295_v33 }
 0x370   :  { %v441_v34 = vpop.xlane.xlu0 %440 }
 0x371   :  { %v443_v35 = vmax.f32 %v441_v34, 1e-30  ;;  %v438_v37 = vpop.xlane.xlu1 %437 }
 0x372   :  { %v442_v38 = vmax.f32 %v438_v37, 1e-30 }
 0x373   :  { %1977 = vrcp.f32 %v443_v35 }
 0x374   :  { %1979 = vrcp.f32 %v442_v38 }
 0x375   :  { %v1937_v39 = vpop.permute.xlu1 %1936 }
 0x376   :  { %v1939_v40 = vunpack.i.h.bf16 %v1937_v39  ;;  %v1938_v41 = vunpack.i.l.bf16 %v1937_v39  ;;  %v1974_v42 = vpop.eup %1973 }
 0x377   :  { %v300_v9 = vmul.f32 %v1974_v42, %v288_v17 }
 0x378   :  { %v1870_v44 = vpack.c.bf16 %v1939_v40, %v1938_v41 }
 0x379   :  { %v1976_v45 = vpop.eup %1975 }
 0x37a   :  { %1871 = vmatprep.subr.bf16.mxu1 %v1870_v44  ;;  %v299_v8 = vmul.f32 %v1976_v45, %v287_v20 }
 0x37c   :  { %1781 = vmatprep.mubr.msk.f32.mxu1 %vm141_vm1, %v299_v8 }
 0x37d   :  { %v1978_v10 = vpop.eup %1977  ;;  %1782 = vmatmul.mubr.msk.f32.vlgmr.msra.gmra.mrb[2].mxu1 %vm141_vm1, %v300_v9 }
 0x37e   :  { %v1980_v46 = vpop.eup %1979  ;;  %1873 = vmatpush3.bf16.msra.mxu1 %v1870_v44  ;;  %v447_v48 = vmul.f32 %v1978_v10, %v435_v26 }
 0x37f   :  { %v446_v47 = vmul.f32 %v1980_v46, %v434_v28  ;;  %1879 = vmatprep.subr.bf16.mxu1 %v1878_v56 }
 0x381   :  { %1788 = vmatprep.mubr.msk.f32.mxu1 %vm141_vm1, %v446_v47 }
 0x382   :  { %1789 = vmatmul.mubr.msk.f32.vlgmr.msra.gmra.mrb[4].mxu1 %vm141_vm1, %v447_v48 }
 0x383   :  { %1881 = vmatpush3.bf16.msra.mxu1 %v1878_v56 }
 0x450   :  { %v1783_v52 = vpop.f32.mrb[2].mxu1 }
 0x451   :  { %v373_v55 = vpop.f32.mrb[3].mxu1 }
 0x455   :  { %v1790_v57 = vpop.f32.mrb[4].mxu1 }
 0x456   :  { %539 = vrot.lane.b32.xlu1 %v1790_v57, %s2042_s30  ;;  %v526_v58 = vpop.f32.mrb[5].mxu1 }
 0x457   :  { %537 = vrot.lane.b32.xlu0 %v526_v58, %s2042_s30 }
 0x4c8   :  { %v540_v60 = vpop.permute.xlu1 %539 }
 0x4c9   :  { %v544_v61 = vsel %vm59_vm0, %v1783_v52, %v540_v60  ;;  %v538_v62 = vpop.permute.xlu0 %537 }
 0x4ca   :  { %v552_v63 = vadd.f32 %v1684_v59, %v544_v61  ;;  %v543_v0 = vsel %vm59_vm0, %v373_v55, %v538_v62 }
 0x4cb   :  { %v551_v1 = vadd.f32 %v1684_v59, %v543_v0 }
 0x4cc   :  { %v2234_v3 = vmax.f32 %v552_v63, 0.0 }
 0x4cd   :  { %v2232_v2 = vmax.f32 %v551_v1, 0.0 }
 0x4cf   :  { %1795 = vmatprep.mubr.msk.f32.mxu0 %vm141_vm1, %v2232_v2 }
 0x4d0   :  { %1796 = vmatmul.mubr.msk.f32.vlgmr.msra.gmra.mrb[2].mxu0 %vm141_vm1, %v2234_v3 }
 0x5a3   :  { %v2240_v4 = vpop.f32.mrb[2].mxu0 }
 0x5a4   :  { %v2242_v5 = vpop.f32.mrb[3].mxu0 }
 0x5a5   :  { %v1947_v11 = vpack.i.bf16 %v2240_v4, %v2242_v5  ;;  %v1882_v12 = vpack.c.bf16 %v2240_v4, %v2242_v5  ;;  %1802 = vmatprep.mubr.msk.f32.mxu1 %vm141_vm1, %v2242_v5 }
 0x5a6   :  { %1803 = vmatmul.mubr.msk.f32.vlgmr.msra.gmra.mrb[6].mxu1 %vm141_vm1, %v2240_v4 }
 0x5a7   :  { %1883 = vmatprep.subr.bf16.mxu0 %v1882_v12 }
 0x5a8   :  { %1885 = vmatpush3.bf16.msra.mxu0 %v1882_v12 }
 0x679   :  { %v1804_v13 = vpop.f32.mrb[6].mxu1 }
 0x67a   :  { %883 = vperm.xlu0 %1940, %v1804_v13   ;;  %v713_v16 = vpop.f32.mrb[7].mxu1 }
 0x67b   :  { %880 = vperm.xlu1 %1941, %v713_v16  }
 0x67e   :  { %1944 = vset.pattern.permute.xlu0 %v2038_v7 }
 0x67f   :  { %729 = vperm.xlu0 %1944, %v1804_v13   ;;  %1942 = vset.pattern.permute.xlu1 %v2040_v15 }
 0x680   :  { %872 = vperm.xlu1 %1942, %v713_v16  }
 0x683   :  { %1945 = vset.pattern.permute.xlu0 %v2037_v6 }
 0x684   :  { %733 = vperm.xlu0 %1945, %v713_v16   ;;  %876 = vperm.xlu1 %1942, %v1804_v13  }
 0x688   :  { %1943 = vset.pattern.permute.xlu1 %v2037_v6  ;;  %1954 = vset.pattern.permute.xlu0 %v2040_v15 }
 0x689   :  { %736 = vperm.xlu1 %1943, %v1804_v13  }
 0x68d   :  { %1946 = vset.pattern.permute.xlu1 %v2038_v7 }
 0x68e   :  { %724 = vperm.xlu1 %1946, %v713_v16  }
 0x692   :  { %1952 = vset.pattern.permute.xlu1 %v2039_v14 }
 0x6f9   :  { %v884_v17 = vpop.permute.xlu0 %883 }
 0x6fa   :  { %v881_v18 = vpop.permute.xlu1 %880  ;;  %v892_v19 = vrot.slane %v884_v17, %v2160_v22 }
 0x6fb   :  { %v888_v20 = vrot.slane %v881_v18, %v2162_v23 }
 0x6fd   :  { %v893_v21 = vsel %vm250_vm2, %v892_v19, %v888_v20 }
 0x6fe   :  { %v730_v25 = vpop.permute.xlu0 %729 }
 0x6ff   :  { %v873_v24 = vpop.permute.xlu1 %872 }
 0x700   :  { %v901_v26 = vadd.f32 %v893_v21, %v873_v24 }
 0x702   :  { %v905_v27 = vmul.f32 0.2, %v901_v26  ;;  %vm903_vm9 = vcmp.ge.f32.partialorder %v901_v26, 0.0 }
 0x703   :  { %v877_v28 = vpop.permute.xlu1 %876  ;;  %v734_v32 = vpop.permute.xlu0 %733 }
 0x704   :  { %v902_v29 = vadd.f32 %v893_v21, %v877_v28  ;;  %v907_v30 = vsel %vm903_vm9, %v901_v26, %v905_v27  ;;  %v741_v38 = vrot.slane %v734_v32, %v2162_v23 }
 0x705   :  { %v909_v31 = vsel %vm2178_vm5, %v907_v30, -1e+30 }
 0x706   :  { %v906_v33 = vmul.f32 0.2, %v902_v29  ;;  %v911_v34 = vsel %vm141_vm1, %v909_v31, -inf  ;;  %vm904_vm10 = vcmp.ge.f32.partialorder %v902_v29, 0.0 }
 0x707   :  { %912 = vmax.xlane.f32.xlu1 %v911_v34 }
 0x708   :  { %v737_v35 = vpop.permute.xlu1 %736  ;;  %v908_v37 = vsel %vm904_vm10, %v902_v29, %v906_v33 }
 0x709   :  { %v745_v39 = vrot.slane %v737_v35, %v2160_v22  ;;  %v910_v40 = vsel %vm2171_vm3, %v908_v37, -1e+30 }
 0x70a   :  { %v914_v41 = vsel %vm141_vm1, %v910_v40, -inf }
 0x70b   :  { %915 = vmax.xlane.f32.xlu0 %v914_v41  ;;  %v746_v42 = vsel %vm250_vm2, %v745_v39, %v741_v38 }
 0x70c   :  { %v755_v44 = vadd.f32 %v746_v42, %v730_v25 }
 0x70d   :  { %v725_v45 = vpop.permute.xlu1 %724 }
 0x70e   :  { %v754_v8 = vadd.f32 %v746_v42, %v725_v45  ;;  %vm757_vm11 = vcmp.ge.f32.partialorder %v755_v44, 0.0  ;;  %v759_v9 = vmul.f32 0.2, %v755_v44  ;;  %v1044_v45 = vld [vmem:[%s2447_s8] sm:$0xff] }
 0x710   :  { %v758_v10 = vmul.f32 0.2, %v754_v8  ;;  %v761_v46 = vsel %vm757_vm11, %v755_v44, %v759_v9  ;;  %vm756_vm12 = vcmp.ge.f32.partialorder %v754_v8, 0.0 }
 0x711   :  { %v763_v47 = vsel %vm2171_vm3, %v761_v46, -1e+30  ;;  %v1047_v46 = vld [vmem:[%s2448_s9 + $0x8] sm:$0xff] }
 0x712   :  { %v767_v48 = vsel %vm141_vm1, %v763_v47, -inf  ;;  %v760_v49 = vsel %vm756_vm12, %v754_v8, %v758_v10  ;;  %v1045_v8 = vld [vmem:[%s2447_s8 + $0x8] sm:$0xff]  ;;  %v1046_v10 = vld [vmem:[%s2448_s9] sm:$0xff] }
 0x713   :  { %768 = vmax.xlane.f32.xlu0 %v767_v48  ;;  %v762_v50 = vsel %vm2178_vm5, %v760_v49, -1e+30  ;;  %v1890_v9 = vpack.c.bf16 %v1045_v8, %v1044_v45 }
 0x714   :  { %v764_v51 = vsel %vm141_vm1, %v762_v50, -inf }
 0x715   :  { %765 = vmax.xlane.f32.xlu1 %v764_v51  ;;  %1891 = vmatprep.subr.bf16.mxu0 %v1890_v9 }
 0x794   :  { %v913_v52 = vpop.xlane.xlu1 %912 }
 0x795   :  { %v917_v53 = vsub.f32 %v909_v31, %v913_v52  ;;  %v1693_v52 = vld [vmem:[%s2446_s7] ss:$0 sm:$0xff] }
 0x797   :  { %v919_v54 = vmul.f32 1.442695, %v917_v53 }
 0x798   :  { %v916_v55 = vpop.xlane.xlu0 %915 }
 0x799   :  { %1981 = vpow2.f32 %v919_v54  ;;  %v918_v56 = vsub.f32 %v910_v40, %v916_v55 }
 0x79b   :  { %v921_v57 = vmul.f32 1.442695, %v918_v56 }
 0x79d   :  { %1983 = vpow2.f32 %v921_v57 }
 0x7a0   :  { %v769_v58 = vpop.xlane.xlu0 %768 }
 0x7a1   :  { %v771_v59 = vsub.f32 %v763_v47, %v769_v58  ;;  %v1894_v47 = vpack.c.bf16 %v1047_v46, %v1046_v10 }
 0x7a2   :  { %v766_v60 = vpop.xlane.xlu1 %765 }
 0x7a3   :  { %v1982_v61 = vpop.eup %1981  ;;  %v774_v62 = vmul.f32 1.442695, %v771_v59  ;;  %v770_v63 = vsub.f32 %v762_v50, %v766_v60 }
 0x7a4   :  { %v923_v0 = vsel %vm2178_vm5, %v1982_v61, 0.0 }
 0x7a5   :  { %v772_v1 = vmul.f32 1.442695, %v770_v63  ;;  %v925_v12 = vsel %vm141_vm1, %v923_v0, 0.0  ;;  %1985 = vpow2.f32 %v774_v62 }
 0x7a6   :  { %926 = vadd.xlane.f32.xlu1 %v925_v12 }
 0x7a7   :  { %v1984_v13 = vpop.eup %1983  ;;  %1987 = vpow2.f32 %v772_v1 }
 0x7a8   :  { %v924_v16 = vsel %vm2171_vm3, %v1984_v13, 0.0 }
 0x7a9   :  { %v928_v17 = vsel %vm141_vm1, %v924_v16, 0.0 }
 0x7aa   :  { %929 = vadd.xlane.f32.xlu0 %v928_v17 }
 0x7af   :  { %v1986_v18 = vpop.eup %1985 }
 0x7b0   :  { %v777_v24 = vsel %vm2171_vm3, %v1986_v18, 0.0 }
 0x7b1   :  { %v1988_v19 = vpop.eup %1987  ;;  %v781_v25 = vsel %vm141_vm1, %v777_v24, 0.0 }
 0x7b2   :  { %v776_v20 = vsel %vm2178_vm5, %v1988_v19, 0.0 }
 0x7b3   :  { %v778_v21 = vsel %vm141_vm1, %v776_v20, 0.0 }
 0x7b4   :  { %779 = vadd.xlane.f32.xlu0 %v778_v21 }
 0x7b7   :  { %1948 = vrot.lane.b32.xlu1 %v1947_v11, %s2041_s1 }
 0x7b8   :  { %782 = vadd.xlane.f32.xlu0 %v781_v25 }
 0x833   :  { %v927_v26 = vpop.xlane.xlu1 %926 }
 0x834   :  { %v931_v27 = vmax.f32 %v927_v26, 1e-30 }
 0x836   :  { %1989 = vrcp.f32 %v931_v27 }
 0x837   :  { %v930_v28 = vpop.xlane.xlu0 %929  ;;  %v1949_v29 = vpop.permute.xlu1 %1948 }
 0x838   :  { %v932_v30 = vmax.f32 %v930_v28, 1e-30  ;;  %v1951_v31 = vunpack.i.h.bf16 %v1949_v29  ;;  %v1950_v32 = vunpack.i.l.bf16 %v1949_v29 }
 0x83a   :  { %1991 = vrcp.f32 %v932_v30  ;;  %v1886_v33 = vpack.c.bf16 %v1951_v31, %v1950_v32 }
 0x83c   :  { %1887 = vmatprep.subr.bf16.mxu1 %v1886_v33 }
 0x83d   :  { %1889 = vmatpush3.bf16.msra.mxu1 %v1886_v33 }
 0x83e   :  { %1895 = vmatprep.subr.bf16.mxu1 %v1894_v47 }
 0x840   :  { %v1990_v34 = vpop.eup %1989 }
 0x841   :  { %v780_v35 = vpop.xlane.xlu0 %779  ;;  %v935_v37 = vmul.f32 %v1990_v34, %v923_v0 }
 0x842   :  { %v784_v4 = vmax.f32 %v780_v35, 1e-30 }
 0x843   :  { %1816 = vmatprep.mubr.msk.f32.mxu1 %vm141_vm1, %v935_v37 }
 0x844   :  { %v1992_v5 = vpop.eup %1991  ;;  %1993 = vrcp.f32 %v784_v4 }
 0x845   :  { %v783_v11 = vpop.xlane.xlu0 %782  ;;  %v936_v38 = vmul.f32 %v1992_v5, %v924_v16 }
 0x846   :  { %v785_v39 = vmax.f32 %v783_v11, 1e-30 }
 0x847   :  { %1817 = vmatmul.mubr.msk.f32.vlgmr.msra.gmra.mrb[8].mxu1 %vm141_vm1, %v936_v38 }
 0x848   :  { %1995 = vrcp.f32 %v785_v39  ;;  %1897 = vmatpush3.bf16.msra.mxu1 %v1894_v47 }
 0x84e   :  { %v1994_v40 = vpop.eup %1993 }
 0x84f   :  { %v788_v41 = vmul.f32 %v1994_v40, %v776_v20 }
 0x851   :  { %1809 = vmatprep.mubr.msk.f32.mxu0 %vm141_vm1, %v788_v41 }
 0x852   :  { %v1996_v42 = vpop.eup %1995 }
 0x853   :  { %v789_v44 = vmul.f32 %v1996_v42, %v777_v24 }
 0x855   :  { %1810 = vmatmul.mubr.msk.f32.vlgmr.msra.gmra.mrb[4].mxu0 %vm141_vm1, %v789_v44 }
 0x856   :  { %1893 = vmatpush3.bf16.msra.mxu0 %v1890_v9 }
 0x91a   :  { %v1818_v48 = vpop.f32.mrb[8].mxu1 }
 0x91b   :  { %1028 = vrot.lane.b32.xlu1 %v1818_v48, %s2042_s30  ;;  %v1015_v49 = vpop.f32.mrb[9].mxu1 }
 0x91c   :  { %1026 = vrot.lane.b32.xlu0 %v1015_v49, %s2042_s30 }
 0x928   :  { %v1811_v50 = vpop.f32.mrb[4].mxu0 }
 0x929   :  { %v862_v51 = vpop.f32.mrb[5].mxu0 }
 0x98d   :  { %v1029_v53 = vpop.permute.xlu1 %1028 }
 0x98e   :  { %v1033_v54 = vsel %vm59_vm0, %v1811_v50, %v1029_v53  ;;  %v1027_v55 = vpop.permute.xlu0 %1026 }
 0x98f   :  { %v1041_v56 = vadd.f32 %v1693_v52, %v1033_v54  ;;  %v1032_v57 = vsel %vm59_vm0, %v862_v51, %v1027_v55 }
 0x990   :  { %v1040_v58 = vadd.f32 %v1693_v52, %v1032_v57 }
 0x991   :  { %v2318_v60 = vmax.f32 %v1041_v56, 0.0 }
 0x992   :  { %v2316_v59 = vmax.f32 %v1040_v58, 0.0 }
 0x994   :  { %1823 = vmatprep.mubr.msk.f32.mxu0 %vm141_vm1, %v2316_v59 }
 0x995   :  { %1824 = vmatmul.mubr.msk.f32.vlgmr.msra.gmra.mrb[6].mxu0 %vm141_vm1, %v2318_v60 }
 0xa68   :  { %v2324_v61 = vpop.f32.mrb[6].mxu0 }
 0xa69   :  { %v2326_v62 = vpop.f32.mrb[7].mxu0 }
 0xa6a   :  { %v1959_v63 = vpack.i.bf16 %v2324_v61, %v2326_v62  ;;  %v1898_v0 = vpack.c.bf16 %v2324_v61, %v2326_v62  ;;  %1830 = vmatprep.mubr.msk.f32.mxu1 %vm141_vm1, %v2326_v62 }
 0xa6b   :  { %1831 = vmatmul.mubr.msk.f32.vlgmr.msra.gmra.mrb[10].mxu1 %vm141_vm1, %v2324_v61 }
 0xa6c   :  { %1899 = vmatprep.subr.bf16.mxu0 %v1898_v0 }
 0xa6d   :  { %1901 = vmatpush3.bf16.msra.mxu0 %v1898_v0 }
 0xb3e   :  { %v1832_v1 = vpop.f32.mrb[10].mxu1 }
 0xb3f   :  { %1365 = vperm.xlu0 %1954, %v1832_v1   ;;  %1372 = vperm.xlu1 %1952, %v1832_v1   ;;  %v1202_v12 = vpop.f32.mrb[11].mxu1 }
 0xb43   :  { %1958 = vset.pattern.permute.xlu0 %v2038_v7  ;;  %1369 = vperm.xlu1 %1952, %v1202_v12  }
 0xb44   :  { %1213 = vperm.xlu0 %1958, %v1202_v12  }
 0xb47   :  { %1953 = vset.pattern.permute.xlu1 %v2040_v15 }
 0xb48   :  { %1361 = vperm.xlu1 %1953, %v1202_v12   ;;  %1964 = vset.pattern.permute.xlu0 %v2039_v14 }
 0xb4c   :  { %1955 = vset.pattern.permute.xlu1 %v2037_v6 }
 0xb4d   :  { %1225 = vperm.xlu1 %1955, %v1832_v1  }
 0xb51   :  { %1956 = vset.pattern.permute.xlu1 %v2038_v7 }
 0xb52   :  { %1218 = vperm.xlu1 %1956, %v1832_v1  }
 0xb56   :  { %1957 = vset.pattern.permute.xlu1 %v2037_v6 }
 0xb57   :  { %1222 = vperm.xlu1 %1957, %v1202_v12  }
 0xbbe   :  { %v1373_v13 = vpop.permute.xlu1 %1372  ;;  %v1366_v19 = vpop.permute.xlu0 %1365 }
 0xbbf   :  { %v1381_v17 = vrot.slane %v1373_v13, %v2160_v22 }
 0xbc2   :  { %v1370_v16 = vpop.permute.xlu1 %1369 }
 0xbc3   :  { %v1377_v18 = vrot.slane %v1370_v16, %v2162_v23  ;;  %v1214_v35 = vpop.permute.xlu0 %1213 }
 0xbc5   :  { %v1382_v15 = vsel %vm250_vm2, %v1381_v17, %v1377_v18 }
 0xbc6   :  { %v1391_v20 = vadd.f32 %v1382_v15, %v1366_v19 }
 0xbc7   :  { %v1362_v14 = vpop.permute.xlu1 %1361 }
 0xbc8   :  { %v1390_v21 = vadd.f32 %v1382_v15, %v1362_v14  ;;  %vm1393_vm13 = vcmp.ge.f32.partialorder %v1391_v20, 0.0  ;;  %v1395_v24 = vmul.f32 0.2, %v1391_v20 }
 0xbca   :  { %v1394_v25 = vmul.f32 0.2, %v1390_v21  ;;  %v1397_v7 = vsel %vm1393_vm13, %v1391_v20, %v1395_v24  ;;  %vm1392_vm14 = vcmp.ge.f32.partialorder %v1390_v21, 0.0 }
 0xbcb   :  { %v1399_v6 = vsel %vm2171_vm3, %v1397_v7, -1e+30 }
 0xbcc   :  { %v1226_v26 = vpop.permute.xlu1 %1225  ;;  %v1403_v27 = vsel %vm141_vm1, %v1399_v6, -inf  ;;  %v1396_v28 = vsel %vm1392_vm14, %v1390_v21, %v1394_v25 }
 0xbcd   :  { %1404 = vmax.xlane.f32.xlu0 %v1403_v27  ;;  %v1398_v29 = vsel %vm2178_vm5, %v1396_v28, -1e+30  ;;  %v1234_v33 = vrot.slane %v1226_v26, %v2160_v22 }
 0xbce   :  { %v1400_v30 = vsel %vm141_vm1, %v1398_v29, -inf }
 0xbcf   :  { %1401 = vmax.xlane.f32.xlu1 %v1400_v30 }
 0xbd1   :  { %v1219_v31 = vpop.permute.xlu1 %1218 }
 0xbd6   :  { %v1223_v32 = vpop.permute.xlu1 %1222 }
 0xbd7   :  { %v1230_v34 = vrot.slane %v1223_v32, %v2162_v23  ;;  %v1553_v32 = vld [vmem:[%s2450_s11 + $0x8] sm:$0xff] }
 0xbd9   :  { %v1235_v37 = vsel %vm250_vm2, %v1234_v33, %v1230_v34  ;;  %v1554_v33 = vld [vmem:[%s2450_s11 + $0x10] sm:$0xff]  ;;  %vm1565_vm2 = vcmask 392192  }
 0xbda   :  { %v1243_v4 = vadd.f32 %v1235_v37, %v1214_v35  ;;  %v1244_v5 = vadd.f32 %v1235_v37, %v1219_v31  ;;  %v1552_v31 = vld [vmem:[%s2450_s11] sm:$0xff]  ;;  %v1555_v35 = vld [vmem:[%s2450_s11 + $0x18] sm:$0xff] }
 0xbdb   :  { %v1906_v34 = vpack.c.bf16 %v1553_v32, %v1552_v31  ;;  %v1910_v37 = vpack.c.bf16 %v1555_v35, %v1554_v33 }
 0xbdc   :  { %vm1246_vm15 = vcmp.ge.f32.partialorder %v1244_v5, 0.0  ;;  %v1248_v11 = vmul.f32 0.2, %v1244_v5  ;;  %vm1245_vm4 = vcmp.ge.f32.partialorder %v1243_v4, 0.0  ;;  %v1247_v38 = vmul.f32 0.2, %v1243_v4 }
 0xbdd   :  { %1907 = vmatprep.subr.bf16.mxu0 %v1906_v34 }
 0xbde   :  { %v1250_v39 = vsel %vm1246_vm15, %v1244_v5, %v1248_v11  ;;  %v1249_v40 = vsel %vm1245_vm4, %v1243_v4, %v1247_v38  ;;  %v1556_v4 = vld [vmem:[%s2450_s11 + $0x20] sm:$0xff]  ;;  %v1557_v5 = vld [vmem:[%s2450_s11 + $0x28] sm:$0xff] }
 0xbdf   :  { %v1252_v41 = vsel %vm2171_vm3, %v1250_v39, -1e+30  ;;  %v1251_v42 = vsel %vm2178_vm5, %v1249_v40, -1e+30  ;;  %v1914_v39 = vpack.c.bf16 %v1557_v5, %v1556_v4 }
 0xbe0   :  { %v1256_v22 = vsel %vm141_vm1, %v1252_v41, -inf  ;;  %v1253_v23 = vsel %vm141_vm1, %v1251_v42, -inf }
 0xbe1   :  { %1257 = vmax.xlane.f32.xlu1 %v1256_v22  ;;  %1254 = vmax.xlane.f32.xlu0 %v1253_v23 }
 0xc5a   :  { %v1405_v44 = vpop.xlane.xlu0 %1404 }
 0xc5b   :  { %v1407_v45 = vsub.f32 %v1399_v6, %v1405_v44 }
 0xc5c   :  { %v1402_v8 = vpop.xlane.xlu1 %1401 }
 0xc5d   :  { %v1410_v9 = vmul.f32 1.442695, %v1407_v45  ;;  %v1406_v10 = vsub.f32 %v1398_v29, %v1402_v8 }
 0xc5f   :  { %1997 = vpow2.f32 %v1410_v9  ;;  %v1408_v46 = vmul.f32 1.442695, %v1406_v10  ;;  %v1651_v10 = vadd.f32 %v2318_v60, %v2234_v3 }
 0xc61   :  { %1999 = vpow2.f32 %v1408_v46 }
 0xc69   :  { %v1998_v47 = vpop.eup %1997 }
 0xc6a   :  { %v1413_v48 = vsel %vm2171_vm3, %v1998_v47, 0.0  ;;  %v1650_v47 = vadd.f32 %v2316_v59, %v2232_v2 }
 0xc6b   :  { %v2000_v49 = vpop.eup %1999  ;;  %v1417_v50 = vsel %vm141_vm1, %v1413_v48, 0.0 }
 0xc6c   :  { %1418 = vadd.xlane.f32.xlu1 %v1417_v50  ;;  %v1412_v51 = vsel %vm2178_vm5, %v2000_v49, 0.0 }
 0xc6d   :  { %v1414_v52 = vsel %vm141_vm1, %v1412_v51, 0.0 }
 0xc6e   :  { %v1255_v53 = vpop.xlane.xlu0 %1254  ;;  %1415 = vadd.xlane.f32.xlu0 %v1414_v52  ;;  %v1258_v54 = vpop.xlane.xlu1 %1257 }
 0xc6f   :  { %v1259_v55 = vsub.f32 %v1251_v42, %v1255_v53  ;;  %v1260_v56 = vsub.f32 %v1252_v41, %v1258_v54  ;;  %v1702_v42 = vld [vmem:[%s2449_s10] ss:$0 sm:$0xff]  ;;  %s2045_s10 = smov [#allocation2]  }
 0xc70   :  { %s1663_s4 = sshll.u32 %s2045_s10, 4  ;;  %s1664_s4 = int_to_ptr.vmem [resolvable:$true] %s1663_s4 }
 0xc71   :  { %v1261_v57 = vmul.f32 1.442695, %v1259_v55  ;;  %v1263_v58 = vmul.f32 1.442695, %v1260_v56  ;;  %s2013_s6 = scalar_lea.vmem %s1664_s4, 256  ;;  %p2018_p1 = scmp.lt.s32.totalorder %s1664_s4, %s1664_s4 }
 0xc72   :  { %p2014_p0 = scmp.ne.s32.totalorder %s1664_s4, %s2013_s6  ;;  %p2019_p2 = scmp.lt.s32.totalorder %s2013_s6, %s2013_s6 }
 0xc73   :  { %2001 = vpow2.f32 %v1261_v57 }
 0xc74   :  { %2003 = vpow2.f32 %v1263_v58  ;;  %p2020_p3 = por %p2019_p2, %p2018_p1 }
 0xc76   :  { %p2021_p4 = pnand %p2020_p3, %p2014_p0 }
 0xc7d   :  { %v2002_v0 = vpop.eup %2001 }
 0xc7e   :  { %v2004_v1 = vpop.eup %2003  ;;  %v1265_v12 = vsel %vm2178_vm5, %v2002_v0, 0.0 }
 0xc7f   :  { %v1267_v13 = vsel %vm141_vm1, %v1265_v12, 0.0  ;;  %v1266_v16 = vsel %vm2171_vm3, %v2004_v1, 0.0 }
 0xc80   :  { %1268 = vadd.xlane.f32.xlu1 %v1267_v13  ;;  %v1270_v17 = vsel %vm141_vm1, %v1266_v16, 0.0 }
 0xc84   :  { %1960 = vrot.lane.b32.xlu0 %v1959_v63, %s2041_s1  ;;  %1271 = vadd.xlane.f32.xlu1 %v1270_v17 }
 0xcf9   :  { %v1419_v18 = vpop.xlane.xlu1 %1418 }
 0xcfa   :  { %v1421_v19 = vmax.f32 %v1419_v18, 1e-30 }
 0xcfb   :  { %v1416_v15 = vpop.xlane.xlu0 %1415 }
 0xcfc   :  { %v1420_v20 = vmax.f32 %v1416_v15, 1e-30  ;;  %2005 = vrcp.f32 %v1421_v19 }
 0xcfe   :  { %2007 = vrcp.f32 %v1420_v20 }
 0xcff   :  { %v1961_v43 = vpop.permute.xlu0 %1960 }
 0xd00   :  { %v1963_v14 = vunpack.i.h.bf16 %v1961_v43  ;;  %v1962_v21 = vunpack.i.l.bf16 %v1961_v43 }
 0xd02   :  { %v1902_v24 = vpack.c.bf16 %v1963_v14, %v1962_v21 }
 0xd04   :  { %1903 = vmatprep.subr.bf16.mxu1 %v1902_v24 }
 0xd05   :  { %1905 = vmatpush3.bf16.msra.mxu1 %v1902_v24 }
 0xd06   :  { %v2006_v36 = vpop.eup %2005 }
 0xd07   :  { %v1425_v6 = vmul.f32 %v2006_v36, %v1413_v48 }
 0xd08   :  { %v2008_v25 = vpop.eup %2007 }
 0xd09   :  { %v1424_v7 = vmul.f32 %v2008_v25, %v1412_v51 }
 0xd0b   :  { %1844 = vmatprep.mubr.msk.f32.mxu1 %vm141_vm1, %v1424_v7 }
 0xd0c   :  { %1845 = vmatmul.mubr.msk.f32.vlgmr.msra.gmra.mrb[12].mxu1 %vm141_vm1, %v1425_v6 }
 0xd0d   :  { %v1269_v61 = vpop.xlane.xlu1 %1268 }
 0xd0e   :  { %v1273_v62 = vmax.f32 %v1269_v61, 1e-30 }
 0xd10   :  { %2009 = vrcp.f32 %v1273_v62 }
 0xd11   :  { %v1272_v63 = vpop.xlane.xlu1 %1271 }
 0xd12   :  { %v1274_v26 = vmax.f32 %v1272_v63, 1e-30 }
 0xd14   :  { %2011 = vrcp.f32 %v1274_v26 }
 0xd1a   :  { %v2010_v27 = vpop.eup %2009 }
 0xd1b   :  { %v1277_v28 = vmul.f32 %v2010_v27, %v1265_v12 }
 0xd1d   :  { %1837 = vmatprep.mubr.msk.f32.mxu0 %vm141_vm1, %v1277_v28 }
 0xd1e   :  { %v2012_v29 = vpop.eup %2011 }
 0xd1f   :  { %v1278_v30 = vmul.f32 %v2012_v29, %v1266_v16 }
 0xd21   :  { %1838 = vmatmul.mubr.msk.f32.vlgmr.msra.gmra.mrb[8].mxu0 %vm141_vm1, %v1278_v30 }
 0xd22   :  { %1909 = vmatpush3.bf16.msra.mxu0 %v1906_v34 }
 0xd23   :  { %1911 = vmatprep.subr.bf16.mxu0 %v1910_v37 }
 0xd26   :  { %1913 = vmatpush3.bf16.msra.mxu0 %v1910_v37 }
 0xd27   :  { %1915 = vmatprep.subr.bf16.mxu0 %v1914_v39 }
 0xd2a   :  { %1917 = vmatpush3.bf16.msra.mxu0 %v1914_v39 }
 0xddf   :  { %v1846_v11 = vpop.f32.mrb[12].mxu1 }
 0xde0   :  { %1517 = vrot.lane.b32.xlu0 %v1846_v11, %s2042_s30  ;;  %v1504_v38 = vpop.f32.mrb[13].mxu1 }
 0xde1   :  { %1515 = vrot.lane.b32.xlu1 %v1504_v38, %s2042_s30 }
 0xde4   :  { %1533 = vrot.lane.b32.xlu0 %v2316_v59, %s2043_s29 }
 0xde5   :  { %1535 = vrot.lane.b32.xlu1 %v2318_v60, %s2043_s29 }
 0xdf4   :  { %v1839_v40 = vpop.f32.mrb[8].mxu0 }
 0xdf5   :  { %v1351_v41 = vpop.f32.mrb[9].mxu0 }
 0xe52   :  { %v1518_v22 = vpop.permute.xlu0 %1517 }
 0xe53   :  { %v1522_v23 = vsel %vm59_vm0, %v1839_v40, %v1518_v22  ;;  %v1516_v44 = vpop.permute.xlu1 %1515 }
 0xe54   :  { %v1530_v45 = vadd.f32 %v1702_v42, %v1522_v23  ;;  %v1521_v8 = vsel %vm59_vm0, %v1351_v41, %v1516_v44  ;;  %vm1549_vm0 = vcmask 261120  }
 0xe55   :  { %v1529_v9 = vadd.f32 %v1702_v42, %v1521_v8 }
 0xe56   :  { %v1532_v46 = vmax.f32 %v1530_v45, 0.0  ;;  %v1534_v52 = vpop.permute.xlu0 %1533 }
 0xe57   :  { %v1531_v48 = vmax.f32 %v1529_v9, 0.0  ;;  %v1536_v51 = vpop.permute.xlu1 %1535  ;;  %v1547_v60 = vsel %vm141_vm1, %v2232_v2, %v1534_v52 }
 0xe58   :  { %v1653_v49 = vadd.f32 %v1651_v10, %v1532_v46  ;;  %1543 = vrot.lane.b32.xlu1 %v1532_v46, %s2044_s15  ;;  %v1548_v59 = vsel %vm141_vm1, %v2234_v3, %v1536_v51 }
 0xe59   :  { %v1652_v50 = vadd.f32 %v1650_v47, %v1531_v48  ;;  %1541 = vrot.lane.b32.xlu0 %v1531_v48, %s2044_s15 }
 0xe5a   :  { %1655 = vst.msk [vmem:[#allocation2 + $0x8] sm:$0xff] %vm141_vm1, %v1653_v49 }
 0xe5b   :  { %1654 = vst.msk [vmem:[#allocation2] sm:$0xff] %vm141_vm1, %v1652_v50 }
 0xeca   :  { %v1544_v53 = vpop.permute.xlu1 %1543 }
 0xecb   :  { %v1542_v54 = vpop.permute.xlu0 %1541  ;;  %v1551_v56 = vsel %vm1549_vm0, %v1548_v59, %v1544_v53 }
 0xecc   :  { %v1550_v55 = vsel %vm1549_vm0, %v1547_v60, %v1542_v54 }
 0xecd   :  { %1859 = vmatprep.mubr.msk.f32.mxu0 %vm1565_vm2, %v1550_v55 }
 0xece   :  { %1860 = vmatmul.mubr.msk.f32.vlgmr.msra.gmra.mrb[10].mxu0 %vm1565_vm2, %v1551_v56 }
 0xecf   :  { %2024 = shalt.err (!%p2021_p4)
}
 0xed0   :  { %s2025_s18 = scalar_lea.hbm %s2453_s14, 256 }
 0xed1   :  { %p2026_p5 = scmp.ne.s32.totalorder %s2453_s14, %s2025_s18  ;;  %p2029_p6 = scmp.lt.u32.totalorder %s2025_s18, %s2453_s14 }
 0xed3   :  { %p2031_p7 = pnand %p2029_p6, %p2026_p5 }
 0xed5   :  { %2034 = shalt.err (!%p2031_p7)
}
 0xed6   :  { %s2046_s22 = smov 128   ;;  %v1703_v2 = vld [vmem:[%s2451_s12] ss:$0 sm:$0xff]  ;;  %vm1647_vm1 = vcmask 31744  }
 0xed7   :  { %1669 = dma.vmem_to_hbm [thread:$0]  %s1664_s4, 256, %s2453_s14, [#allocation3], %s2046_s22, %s2046_s22, %s2042_s30  }
 0xfa1   :  { %v1861_v3 = vpop.f32.mrb[10].mxu0 }
 0xfa2   :  { %v1644_v57 = vadd.f32 %v1861_v3, %v1703_v2  ;;  %v1638_v58 = vpop.f32.mrb[11].mxu0 }
 0xfa3   :  { %v1639_v0 = vadd.f32 %v1703_v2, %v1638_v58 }
 0xfa4   :  { %1649 = vst.msk [vmem:[%s2452_s13 + $0x8] sm:$0xff] %vm1647_vm1, %v1644_v57 }
 0xfa5   :  { %1648 = vst.msk [vmem:[%s2452_s13] sm:$0xff] %vm1647_vm1, %v1639_v0 }
 0xfa6   :  { %2035 = dma.done.wait [#allocation3], 256  }
 0xfa7   :  { %2036 = vsyncadd [#allocation3], 4294967040 }
 0xfa8   :  { %1675 = vsyncpa [#allocation3], 1 }

</bundles_post_ra>
